<compile_context>
chip_gen: v5e
topology: v5e:2x2
jax: 0.10.0
libtpu: 0.0.40
codegen_flags: <defaults>
</compile_context>

<pallas_src>
import functools

import jax
import jax.numpy as jnp
from jax.experimental import pallas as pl
from jax.experimental.pallas import tpu as pltpu

LANES = 128              # vreg lane width
SUBLANES = 8             # f32 sublanes per vreg
MAX_BLOCK_ROWS = 8192    # 8192 x 128 f32 = 4 MiB per input pipeline buffer
CHUNK_ROWS = 512         # in-kernel accumulation chunk (multiple of 32)
NUM_CORES = 2            # megacore split (harmless no-op on 1-TC chips)
VMEM_LIMIT_BYTES = 40 * 1024 * 1024


def _round_up(x, m):
    return ((x + m - 1) // m) * m


def _sublane_align(*dtypes):
    """Sublane multiple honoring sub-32-bit packing (f32->8, bf16->16, int8->32)."""
    align = SUBLANES
    for dt in dtypes:
        bits = jnp.dtype(dt).itemsize * 8
        align = max(align, SUBLANES * max(1, 32 // bits))
    return align


def _iou_sums_kernel(p_ref, t_ref, acc_i_ref, acc_s_ref, *,
                     rows, block_rows, chunk_rows, steps, steps_per_core,
                     need_mask, has_phantom):
    """Accumulate sum(p*t) and sum(p+t) into per-core (1,8,128) outputs."""
    c = pl.program_id(0)
    k = pl.program_id(1)
    gstep = c * steps_per_core + k   # global block index along the rows axis

    @pl.when(k == 0)
    def _init():
        acc_i_ref[...] = jnp.zeros_like(acc_i_ref)
        acc_s_ref[...] = jnp.zeros_like(acc_s_ref)

    def _load(off, size):
        # Upcast in-register (PyTorch .float()); the DMA streamed native dtype.
        return (p_ref[pl.ds(off, size), :].astype(jnp.float32),
                t_ref[pl.ds(off, size), :].astype(jnp.float32))

    def _accum(p, t):
        # Fold onto the (8,128) vreg-shaped accumulators with plain VPU adds;
        # the expensive cross-lane reduce happens once, in the wrapper.
        acc_i_ref[...] += (p * t).reshape(-1, SUBLANES, LANES).sum(
            axis=0, keepdims=True)
        acc_s_ref[...] += (p + t).reshape(-1, SUBLANES, LANES).sum(
            axis=0, keepdims=True)

    def _accum_full_block():
        @pl.loop(0, block_rows // chunk_rows)
        def _(ci):
            off = pl.multiple_of(ci * chunk_rows, chunk_rows)
            _accum(*_load(off, chunk_rows))

    if not need_mask and not has_phantom:
        # Every step is a full, real block: no predication at all.
        _accum_full_block()
    else:
        # Hot path: full, real blocks — no iota / compare / select.
        hot_limit = steps - 1 if need_mask else steps

        @pl.when(gstep < hot_limit)
        def _hot():
            _accum_full_block()

        if need_mask:
            # Cold path: the single partial last block.
            tail_rows = rows - (steps - 1) * block_rows      # static int
            full_chunks = tail_rows // chunk_rows            # static int
            rem_rows = tail_rows - full_chunks * chunk_rows  # static int

            @pl.when(gstep == steps - 1)
            def _tail():
                if full_chunks:
                    @pl.loop(0, full_chunks)
                    def _(ci):
                        off = pl.multiple_of(ci * chunk_rows, chunk_rows)
                        _accum(*_load(off, chunk_rows))
                if rem_rows:
                    # Zero BOTH operands past the end of the data BEFORE any
                    # multiply/add (the buffer holds garbage there).
                    p, t = _load(full_chunks * chunk_rows, chunk_rows)
                    row_id = jax.lax.broadcasted_iota(
                        jnp.int32, (chunk_rows, LANES), 0)
                    valid = row_id < rem_rows
                    _accum(jnp.where(valid, p, 0.0),
                           jnp.where(valid, t, 0.0))
        # Phantom steps (gstep >= steps, only possible when has_phantom) fall
        # through both pl.when's and do no compute.


def iou_loss(pred, true, eps=1e-8):
    """Pallas equivalent of IoULoss.forward(pred, true, eps)."""
    p = jnp.ravel(pred)
    t = jnp.ravel(true)
    assert p.size == t.size, f"pred.size:{p.size}, true.size:{t.size}"
    n = p.size

    rows = pl.cdiv(n, LANES)
    align = _sublane_align(p.dtype, t.dtype)

    if rows <= MAX_BLOCK_ROWS:
        # Single streaming block: round rows up so the block satisfies the
        # (8,128) rule and the dtype's sublane packing, and so the in-kernel
        # chunk size divides it evenly.
        if rows <= CHUNK_ROWS:
            rows_padded = _round_up(rows, align)
            chunk_rows = rows_padded
        else:
            rows_padded = _round_up(rows, max(CHUNK_ROWS, align))
            chunk_rows = CHUNK_ROWS
        block_rows = rows_padded
    else:
        rows_padded = rows            # partial tail block handled in-kernel
        block_rows = MAX_BLOCK_ROWS
        chunk_rows = CHUNK_ROWS

    pad = rows_padded * LANES - n
    if pad:
        # Lane/sublane alignment pad only (zeros contribute 0 to both sums);
        # for multi-block inputs this is < 128 elements.
        p = jnp.pad(p, (0, pad))
        t = jnp.pad(t, (0, pad))

    p2 = p.reshape(rows_padded, LANES)
    t2 = t.reshape(rows_padded, LANES)

    steps = pl.cdiv(rows_padded, block_rows)
    need_mask = (rows_padded % block_rows) != 0

    num_cores = NUM_CORES if steps >= 2 else 1
    steps_per_core = pl.cdiv(steps, num_cores)
    has_phantom = num_cores * steps_per_core != steps

    if has_phantom:
        def in_map(c, k):
            # Clamp the single phantom step onto the last real block; its
            # compute is skipped in-kernel, so at most one block of DMA is
            # wasted.
            return (jnp.minimum(c * steps_per_core + k, steps - 1), 0)
    else:
        def in_map(c, k):
            return (c * steps_per_core + k, 0)

    kernel = functools.partial(
        _iou_sums_kernel,
        rows=rows_padded, block_rows=block_rows, chunk_rows=chunk_rows,
        steps=steps, steps_per_core=steps_per_core,
        need_mask=need_mask, has_phantom=has_phantom)

    acc_i, acc_s = pl.pallas_call(
        kernel,
        out_shape=(
            jax.ShapeDtypeStruct((num_cores, SUBLANES, LANES), jnp.float32),
            jax.ShapeDtypeStruct((num_cores, SUBLANES, LANES), jnp.float32),
        ),
        grid_spec=pltpu.PrefetchScalarGridSpec(
            num_scalar_prefetch=0,
            grid=(num_cores, steps_per_core),
            in_specs=[
                pl.BlockSpec((block_rows, LANES), in_map),
                pl.BlockSpec((block_rows, LANES), in_map),
            ],
            out_specs=[
                pl.BlockSpec((1, SUBLANES, LANES), lambda c, k: (c, 0, 0)),
                pl.BlockSpec((1, SUBLANES, LANES), lambda c, k: (c, 0, 0)),
            ],
        ),
        compiler_params=pltpu.CompilerParams(
            dimension_semantics=("parallel", "arbitrary"),
            vmem_limit_bytes=VMEM_LIMIT_BYTES,
        ),
    )(p2, t2)

    # Tiny epilogue: one cross-lane reduce per accumulator, then the IoU.
    i_sum = jnp.sum(acc_i)
    u_sum = jnp.sum(acc_s) - i_sum
    return 1.0 - i_sum / (u_sum + jnp.float32(eps))


def iou_loss_ref(pred, true, eps=1e-8):
    """Pure-JAX reference matching the PyTorch module exactly."""
    p = jnp.ravel(pred).astype(jnp.float32)
    t = jnp.ravel(true).astype(jnp.float32)
    i = p * t
    u = p + t - i
    return 1.0 - i.sum() / (u.sum() + eps)


if __name__ == "__main__":
    key = jax.random.PRNGKey(0)
    kp, kt, kp2, kt2, kp3, kt3 = jax.random.split(key, 6)

    # Small NCHW segmentation-style inputs (single-block, no-mask path).
    pred = jax.random.uniform(kp, (2, 4, 16, 16), dtype=jnp.float32)
    true = (jax.random.uniform(kt, (2, 4, 16, 16)) > 0.5).astype(jnp.float32)
    out = jax.block_until_ready(iou_loss(pred, true))
    ref = iou_loss_ref(pred, true)
    assert jnp.allclose(out, ref, atol=1e-6, rtol=1e-6), (out, ref)

    # Odd numel: exercises the wrapper-side lane-alignment pad.
    pred1 = jax.random.uniform(kp3, (3, 5, 7), dtype=jnp.float32)
    true1 = (jax.random.uniform(kt3, (3, 5, 7)) > 0.5).astype(jnp.float32)
    out1 = jax.block_until_ready(iou_loss(pred1, true1))
    ref1 = iou_loss_ref(pred1, true1)
    assert jnp.allclose(out1, ref1, atol=1e-6, rtol=1e-6), (out1, ref1)

    # bf16 inputs large enough to exercise the multi-block grid, the two-core
    # split, the odd-step phantom clamp, the predicated tail mask and the
    # in-kernel upcast (no wrapper-side f32 copy).
    pred2 = jax.random.uniform(kp2, (2, 6, 420, 420)).astype(jnp.bfloat16)
    true2 = (jax.random.uniform(kt2, (2, 6, 420, 420)) > 0.5).astype(jnp.bfloat16)
    out2 = jax.block_until_ready(iou_loss(pred2, true2))
    ref2 = iou_loss_ref(pred2, true2)
    assert jnp.allclose(out2, ref2, atol=1e-4, rtol=1e-4), (out2, ref2)

    print("KERNEL_OK")
</pallas_src>

<mosaic_0001>
module attributes {stable_mosaic.version = 11 : i64} {
  func.func @_iou_sums_kernel(%arg0: i32, %arg1: i32, %arg2: memref<16x128xf32, #tpu.memory_space<vmem>>, %arg3: memref<16x128xf32, #tpu.memory_space<vmem>>, %arg4: memref<1x8x128xf32, #tpu.memory_space<vmem>>, %arg5: memref<1x8x128xf32, #tpu.memory_space<vmem>>) attributes {dimension_semantics = [#tpu.dimension_semantics<parallel>, #tpu.dimension_semantics<arbitrary>], iteration_bounds = array<i64: 1, 1>, scalar_prefetch = 0 : i64, scratch_operands = 0 : i64, tpu.core_type = #tpu.core_type<tc>, window_params = [{transform_indices = @transform_0, window_bounds = array<i64: 16, 128>}, {transform_indices = @transform_1, window_bounds = array<i64: 16, 128>}, {transform_indices = @transform_2, window_bounds = array<i64: 1, 8, 128>}, {transform_indices = @transform_3, window_bounds = array<i64: 1, 8, 128>}]} {
    %c0_i32 = arith.constant 0 : i32
    %0 = arith.cmpi eq, %arg1, %c0_i32 : i32
    %1 = arith.extui %0 : i1 to i32
    %c0_i32_0 = arith.constant 0 : i32
    %2 = arith.cmpi ne, %1, %c0_i32_0 : i32
    scf.if %2 {
      %cst_18 = arith.constant 0.000000e+00 : f32
      %25 = vector.broadcast %cst_18 : f32 to vector<1x8x128xf32>
      %c0_19 = arith.constant 0 : index
      %c0_20 = arith.constant 0 : index
      %c0_21 = arith.constant 0 : index
      %26 = vector.load %arg4[%c0_19, %c0_20, %c0_21] : memref<1x8x128xf32, #tpu.memory_space<vmem>>, vector<1x8x128xf32>
      tpu.vector_store %arg4[%c0_19, %c0_20, %c0_21], %25 {strides = array<i32>} : memref<1x8x128xf32, #tpu.memory_space<vmem>>, vector<1x8x128xf32>,
      %cst_22 = arith.constant 0.000000e+00 : f32
      %27 = vector.broadcast %cst_22 : f32 to vector<1x8x128xf32>
      %c0_23 = arith.constant 0 : index
      %c0_24 = arith.constant 0 : index
      %c0_25 = arith.constant 0 : index
      %28 = vector.load %arg5[%c0_23, %c0_24, %c0_25] : memref<1x8x128xf32, #tpu.memory_space<vmem>>, vector<1x8x128xf32>
      tpu.vector_store %arg5[%c0_23, %c0_24, %c0_25], %27 {strides = array<i32>} : memref<1x8x128xf32, #tpu.memory_space<vmem>>, vector<1x8x128xf32>,
    } else {
    }
    %c0_i32_1 = arith.constant 0 : i32
    %c1_i32 = arith.constant 1 : i32
    %3 = arith.muli %c0_i32_1, %c1_i32 : i32
    %c0_i32_2 = arith.constant 0 : i32
    %4 = arith.addi %c0_i32_2, %3 : i32
    %c16_i32 = arith.constant 16 : i32
    %5 = arith.muli %4, %c16_i32 : i32
    %6 = tpu.assume_multiple %5, 16 : i32
    %7 = arith.index_cast %6 : i32 to index
    %c0 = arith.constant 0 : index
    %8 = vector.load %arg2[%7, %c0] : memref<16x128xf32, #tpu.memory_space<vmem>>, vector<16x128xf32>
    %9 = arith.index_cast %6 : i32 to index
    %c0_3 = arith.constant 0 : index
    %10 = vector.load %arg3[%9, %c0_3] : memref<16x128xf32, #tpu.memory_space<vmem>>, vector<16x128xf32>
    %c0_4 = arith.constant 0 : index
    %c0_5 = arith.constant 0 : index
    %c0_6 = arith.constant 0 : index
    %11 = vector.load %arg4[%c0_4, %c0_5, %c0_6] : memref<1x8x128xf32, #tpu.memory_space<vmem>>, vector<1x8x128xf32>
    %12 = arith.mulf %8, %10 : vector<16x128xf32>
    %13 = vector.shape_cast %12 : vector<16x128xf32> to vector<2x8x128xf32>
    %cst = arith.constant dense<0.000000e+00> : vector<8x128xf32>
    %14 = vector.multi_reduction <add>, %13, %cst [0] : vector<2x8x128xf32> to vector<8x128xf32>
    %15 = vector.shape_cast %14 : vector<8x128xf32> to vector<1x8x128xf32>
    %16 = arith.addf %11, %15 : vector<1x8x128xf32>
    %c0_7 = arith.constant 0 : index
    %c0_8 = arith.constant 0 : index
    %c0_9 = arith.constant 0 : index
    %17 = vector.load %arg4[%c0_7, %c0_8, %c0_9] : memref<1x8x128xf32, #tpu.memory_space<vmem>>, vector<1x8x128xf32>
    tpu.vector_store %arg4[%c0_7, %c0_8, %c0_9], %16 {strides = array<i32>} : memref<1x8x128xf32, #tpu.memory_space<vmem>>, vector<1x8x128xf32>,
    %c0_10 = arith.constant 0 : index
    %c0_11 = arith.constant 0 : index
    %c0_12 = arith.constant 0 : index
    %18 = vector.load %arg5[%c0_10, %c0_11, %c0_12] : memref<1x8x128xf32, #tpu.memory_space<vmem>>, vector<1x8x128xf32>
    %19 = arith.addf %8, %10 : vector<16x128xf32>
    %20 = vector.shape_cast %19 : vector<16x128xf32> to vector<2x8x128xf32>
    %cst_13 = arith.constant dense<0.000000e+00> : vector<8x128xf32>
    %21 = vector.multi_reduction <add>, %20, %cst_13 [0] : vector<2x8x128xf32> to vector<8x128xf32>
    %22 = vector.shape_cast %21 : vector<8x128xf32> to vector<1x8x128xf32>
    %23 = arith.addf %18, %22 : vector<1x8x128xf32>
    %c0_14 = arith.constant 0 : index
    %c0_15 = arith.constant 0 : index
    %c0_16 = arith.constant 0 : index
    %24 = vector.load %arg5[%c0_14, %c0_15, %c0_16] : memref<1x8x128xf32, #tpu.memory_space<vmem>>, vector<1x8x128xf32>
    tpu.vector_store %arg5[%c0_14, %c0_15, %c0_16], %23 {strides = array<i32>} : memref<1x8x128xf32, #tpu.memory_space<vmem>>, vector<1x8x128xf32>,
    %c1_i32_17 = arith.constant 1 : i32
    return
  }
  func.func @transform_0(%arg0: i32, %arg1: i32) -> (i32, i32) {
    %c1_i32 = arith.constant 1 : i32
    %0 = arith.muli %arg0, %c1_i32 : i32
    %1 = arith.addi %0, %arg1 : i32
    %c0_i32 = arith.constant 0 : i32
    %c0_i32_0 = arith.constant 0 : i32
    return %1, %c0_i32 : i32, i32
  }
  func.func @transform_1(%arg0: i32, %arg1: i32) -> (i32, i32) {
    %c1_i32 = arith.constant 1 : i32
    %0 = arith.muli %arg0, %c1_i32 : i32
    %1 = arith.addi %0, %arg1 : i32
    %c0_i32 = arith.constant 0 : i32
    %c0_i32_0 = arith.constant 0 : i32
    return %1, %c0_i32 : i32, i32
  }
  func.func @transform_2(%arg0: i32, %arg1: i32) -> (i32, i32, i32) {
    %c0_i32 = arith.constant 0 : i32
    %c0_i32_0 = arith.constant 0 : i32
    %c0_i32_1 = arith.constant 0 : i32
    return %arg0, %c0_i32, %c0_i32_0 : i32, i32, i32
  }
  func.func @transform_3(%arg0: i32, %arg1: i32) -> (i32, i32, i32) {
    %c0_i32 = arith.constant 0 : i32
    %c0_i32_0 = arith.constant 0 : i32
    %c0_i32_1 = arith.constant 0 : i32
    return %arg0, %c0_i32, %c0_i32_0 : i32, i32, i32
  }
}

</mosaic_0001>

<bundles_post_ra>
// kernel: tpu_custom_call.1
= control target key start
LH: loop header
LB: loop body
LE: loop exit
PB: predicated region body
PF: predicated region fallthrough
CT: control target
= control target key end

     0   :  { %9 = vsyncpa [#allocation3], 0  ;;  %s264_s0 = inlined_call_operand.hbm [shape: f32[16,128], index: 0, kind: input, shape index: {}]   ;;  %s265_s1 = inlined_call_operand.hbm [shape: f32[16,128], index: 1, kind: input, shape index: {}]   ;;  %s266_s2 = inlined_call_operand.hbm [shape: f32[1,8,128], index: 2, kind: output, shape index: {0}]   ;;  %s267_s3 = inlined_call_operand.hbm [shape: f32[1,8,128], index: 3, kind: output, shape index: {1}]  }
   0x1   :  { %10 = vsyncpa [#allocation6], 0 }
   0x2   :  { %11 = vsyncpa [#allocation4], 0 }
   0x3   :  { %12 = vsyncpa [#allocation9], 0  ;;  %s21_s14 = sshll.u32 %s264_s0, 4  ;;  %s226_s15 = smov [#allocation2]   ;;  %s22_s14 = int_to_ptr.hbm [resolvable:$true] %s21_s14 }
   0x4   :  { %s23_s16 = sshll.u32 %s226_s15, 4  ;;  %s38_s19 = sshll.u32 %s265_s1, 4  ;;  %s24_s16 = int_to_ptr.vmem [resolvable:$true] %s23_s16  ;;  %s39_s19 = int_to_ptr.hbm [resolvable:$true] %s38_s19 }
   0x5   :  { %s227_s20 = smov 128   ;;  %s228_s21 = smov 8  }
   0x6   :  { %29 = dma.hbm_to_vmem [thread:$0]  %s22_s14, 256, %s24_s16, [#allocation3], %s227_s20, %s227_s20, %s228_s21  }
   0x7   :  { %s229_s22 = smov [#allocation5]  }
   0x8   :  { %s40_s23 = sshll.u32 %s229_s22, 4  ;;  %s41_s23 = int_to_ptr.vmem [resolvable:$true] %s40_s23 }
   0x9   :  { %46 = dma.hbm_to_vmem [thread:$0]  %s39_s19, 256, %s41_s23, [#allocation6], %s227_s20, %s227_s20, %s228_s21  }
   0xa   :  { %218 = dma.done.wait [#allocation3], 256  }
   0xb   :  { %219 = vsyncadd [#allocation3], 4294967040 }
   0xc   :  { %220 = dma.done.wait [#allocation6], 256  }
   0xd   :  { %221 = vsyncadd [#allocation6], 4294967040  ;;  %v65_v0 = vld [vmem:[#allocation2] sm:$0xff]  ;;  %v66_v1 = vld [vmem:[#allocation2 + $0x8] sm:$0xff]  ;;  %s230_s0 = smov [#allocation7]   ;;  %s88_s26 = sshll.u32 %s266_s2, 4  ;;  %s89_s26 = int_to_ptr.hbm [resolvable:$true] %s88_s26 }
   0xe   :  { %v67_v2 = vld [vmem:[#allocation5] sm:$0xff]  ;;  %v68_v3 = vld [vmem:[#allocation5 + $0x8] sm:$0xff]  ;;  %s86_s1 = sshll.u32 %s230_s0, 4  ;;  %s231_s27 = smov [#allocation8]   ;;  %s87_s1 = int_to_ptr.vmem [resolvable:$true] %s86_s1 }
   0xf   :  { %v70_v4 = vmul.f32 %v67_v2, %v65_v0  ;;  %v76_v5 = vadd.f32 %v67_v2, %v65_v0  ;;  %v71_v6 = vmul.f32 %v68_v3, %v66_v1  ;;  %v77_v7 = vadd.f32 %v68_v3, %v66_v1  ;;  %s97_s28 = sshll.u32 %s231_s27, 4  ;;  %s99_s4 = sshll.u32 %s267_s3, 4  ;;  %s98_s28 = int_to_ptr.vmem [resolvable:$true] %s97_s28  ;;  %s100_s4 = int_to_ptr.hbm [resolvable:$true] %s99_s4 }
  0x11   :  { %v72_v8 = vadd.f32 %v71_v6, %v70_v4  ;;  %v78_v9 = vadd.f32 %v77_v7, %v76_v5 }
  0x13   :  { %74 = vst [vmem:[#allocation7] sm:$0xff] %v72_v8 }
  0x14   :  { %80 = vst [vmem:[#allocation8] sm:$0xff] %v78_v9  ;;  %91 = dma.vmem_to_hbm [thread:$0]  %s87_s1, 128, %s89_s26, [#allocation4]  }
  0x15   :  { %102 = dma.vmem_to_hbm [thread:$0]  %s98_s28, 128, %s100_s4, [#allocation9]  }
  0x16   :  { %222 = dma.done.wait [#allocation4], 128  }
  0x17   :  { %223 = vsyncadd [#allocation4], 4294967168 }
  0x18   :  { %224 = dma.done.wait [#allocation9], 128  }
  0x19   :  { %225 = vsyncadd [#allocation9], 4294967168 }
  0x1a   :  { %111 = vsyncpa [#allocation3], 1 }
  0x1b   :  { %112 = vsyncpa [#allocation6], 1 }
  0x1c   :  { %113 = vsyncpa [#allocation4], 1 }
  0x1d   :  { %114 = vsyncpa [#allocation9], 1 }

</bundles_post_ra>
